<compile_context>
chip_gen: v5e
topology: v5e:2x2
jax: 0.10.0
libtpu: 0.0.40
codegen_flags: <defaults>
</compile_context>

<pallas_src>
import math
import functools

import jax
import jax.numpy as jnp
from jax.experimental import pallas as pl
from jax.experimental.pallas import tpu as pltpu


# ---------------------------------------------------------------------------
# Kernels
# ---------------------------------------------------------------------------
def _pe_add_kernel(x_ref, pe_ref, o_ref, *, batch):
    """Eval-mode path: out = x + pe (dropout is identity).

    x_ref/o_ref: (ts, B*D) block; pe_ref: (ts, D) block of the raw table,
    replicated across batch along the lane axis inside the kernel so no
    x-sized pe is ever materialized in HBM.
    """
    pe = pe_ref[...].astype(o_ref.dtype)                 # (ts, D)
    if batch > 1:
        pe = jnp.concatenate([pe] * batch, axis=-1)      # (ts, B*D) lane replication
    o_ref[...] = x_ref[...] + pe


def _pe_add_dropout_kernel(seed_ref, x_ref, pe_ref, o_ref, *, batch, p):
    """Training-mode path: fused (x + pe) + inverted dropout via the on-chip PRNG.

    TODO(synk): torch's dropout RNG stream cannot be reproduced bit-for-bit;
    this uses the TPU hardware PRNG with a user seed.  Not exercised in the
    __main__ demo because pltpu.prng_* has no CPU/interpret-mode lowering.
    """
    # Per-tile seed, mixed with a large odd multiplier so nearby user seeds do
    # not alias each other's per-tile streams.
    pltpu.prng_seed(seed_ref[0] * jnp.int32(1640531527) + pl.program_id(0))
    pe = pe_ref[...].astype(jnp.float32)
    if batch > 1:
        pe = jnp.concatenate([pe] * batch, axis=-1)
    y = x_ref[...].astype(jnp.float32) + pe              # dropout math in f32
    bits = pltpu.bitcast(pltpu.prng_random_bits(y.shape), jnp.uint32)
    thresh = jnp.uint32(min(int(p * 4294967296.0), 4294967295))
    keep = bits >= thresh                                 # P(keep) ~= 1 - p
    y = jnp.where(keep, y * jnp.float32(1.0 / (1.0 - p)), 0.0)
    o_ref[...] = y.astype(o_ref.dtype)


# ---------------------------------------------------------------------------
# Parameter / buffer construction (plain JAX glue)
# ---------------------------------------------------------------------------
def make_sinusoidal_pe(d_model, max_len=5000, dtype=jnp.float32):
    """Deterministic sinusoidal table, identical math to the PyTorch __init__."""
    position = jnp.arange(max_len, dtype=jnp.float32)[:, None]              # (max_len, 1)
    div_term = jnp.exp(
        jnp.arange(0, d_model, 2, dtype=jnp.float32) * (-math.log(10000.0) / d_model)
    )                                                                        # (d_model//2,)
    pe = jnp.zeros((max_len, d_model), dtype=jnp.float32)
    pe = pe.at[:, 0::2].set(jnp.sin(position * div_term))
    pe = pe.at[:, 1::2].set(jnp.cos(position * div_term))
    # unsqueeze(0).transpose(0, 1) -> (max_len, 1, d_model)
    return pe[:, None, :].astype(dtype)


# ---------------------------------------------------------------------------
# Tiling helpers
# ---------------------------------------------------------------------------
_TARGET_X_BLOCK_BYTES = 4 << 20      # ~4 MiB of x per grid step (halved w/ dropout)
_LANE = 128


def _round_up(n, m):
    return ((n + m - 1) // m) * m


def _sublane_granule(itemsize):
    # 8 sublanes for 4-byte, 16 for 2-byte, 32 for 1-byte dtypes.
    return max(8, 32 // max(1, int(itemsize)))


def _pick_rows(total_rows, row_bytes, target_bytes, granule):
    """Rows per block: ~target_bytes of x, a multiple of `granule`, and at
    least two grid steps whenever the row count allows (v7x has 2 TCs)."""
    if total_rows < 2 * granule:
        return total_rows
    rt = max(granule, int(target_bytes) // max(1, row_bytes))
    rt = min(rt, (total_rows + 1) // 2)          # >= 2 grid steps
    rt = max(granule, (rt // granule) * granule)
    return min(rt, total_rows)


# ---------------------------------------------------------------------------
# Forward wrapper
# ---------------------------------------------------------------------------
def positional_encoding_forward(x, pe, *, dropout_p=0.1, training=False, seed=0):
    """x: (S, B, D) float, pe: (max_len, 1, D) sinusoidal table. Returns (S, B, D)."""
    S, B, D = x.shape
    max_len = pe.shape[0]
    assert pe.shape[-1] == D and S <= max_len

    use_dropout = bool(training) and float(dropout_p) > 0.0
    if use_dropout and not float(dropout_p) < 1.0:
        raise ValueError("dropout_p must be < 1.0 in training mode")

    pe2d = pe.reshape(max_len, D)                 # contiguous -> free view, no cast
    x2 = x.reshape(S, B * D)                      # contiguous -> free view

    itemsize = x.dtype.itemsize
    granule = _sublane_granule(itemsize)
    xrow = _round_up(B * D, _LANE) * itemsize                        # padded VMEM bytes/row
    perow = _round_up(D, _LANE) * pe2d.dtype.itemsize
    target = _TARGET_X_BLOCK_BYTES // (2 if use_dropout else 1)
    ts = _pick_rows(S, xrow, target, granule)
    grid = (pl.cdiv(S, ts),)

    # Explicit scoped-VMEM budget: double-buffered x / out / pe blocks plus
    # in-kernel temps (pe lane replication, dropout bits/mask), padding included.
    est = ts * (2 * (2 * xrow + perow) + 2 * xrow) + (1 << 20)
    vmem_limit = int(min(64 << 20, max(est, 32 << 20)))

    compiler_params = pltpu.CompilerParams(
        dimension_semantics=("parallel",),        # no cross-step dependency
        vmem_limit_bytes=vmem_limit,
    )
    out_shape = jax.ShapeDtypeStruct((S, B * D), x.dtype)

    if not use_dropout:
        row_map = lambda i: (i, 0)
        out = pl.pallas_call(
            functools.partial(_pe_add_kernel, batch=B),
            out_shape=out_shape,
            grid_spec=pltpu.PrefetchScalarGridSpec(
                num_scalar_prefetch=0,
                grid=grid,
                in_specs=[pl.BlockSpec((ts, B * D), row_map),
                          pl.BlockSpec((ts, D), row_map)],
                out_specs=pl.BlockSpec((ts, B * D), row_map),
            ),
            compiler_params=compiler_params,
        )(x2, pe2d)
    else:
        row_map = lambda i, _seed_ref: (i, 0)     # scalar-prefetch ref is trailing arg
        seed_arr = jnp.asarray([seed], dtype=jnp.int32)
        out = pl.pallas_call(
            functools.partial(_pe_add_dropout_kernel, batch=B, p=float(dropout_p)),
            out_shape=out_shape,
            grid_spec=pltpu.PrefetchScalarGridSpec(
                num_scalar_prefetch=1,
                grid=grid,
                in_specs=[pl.BlockSpec((ts, B * D), row_map),
                          pl.BlockSpec((ts, D), row_map)],
                out_specs=pl.BlockSpec((ts, B * D), row_map),
            ),
            compiler_params=compiler_params,
        )(seed_arr, x2, pe2d)

    return out.reshape(S, B, D)


# ---------------------------------------------------------------------------
# Demo / correctness check (eval mode; training path needs a real TPU PRNG)
# ---------------------------------------------------------------------------
if __name__ == "__main__":
    max_len = 5000

    # --- small shape consistent with the module: seq=8, batch=2, d_model=32 ---
    d_model, seq_len, batch = 32, 8, 2
    key = jax.random.PRNGKey(0)
    x = jax.random.normal(key, (seq_len, batch, d_model), dtype=jnp.float32)
    pe = make_sinusoidal_pe(d_model, max_len=max_len)          # (max_len, 1, d_model)

    out = positional_encoding_forward(x, pe, dropout_p=0.1, training=False)
    out = jax.block_until_ready(out)
    ref = x + pe[:seq_len, :]
    assert out.shape == (seq_len, batch, d_model)
    assert out.dtype == x.dtype
    assert jnp.allclose(out, ref, atol=1e-6, rtol=1e-6), "eval-mode mismatch vs reference"

    # --- lane-dense d_model: exercises the multi-step grid (2 blocks) ----------
    s2, b2, d2 = 64, 4, 256
    x2 = jax.random.normal(jax.random.PRNGKey(1), (s2, b2, d2), dtype=jnp.float32)
    pe2 = make_sinusoidal_pe(d2, max_len=max_len)
    out2 = jax.block_until_ready(positional_encoding_forward(x2, pe2, training=False))
    ref2 = x2 + pe2[:s2, :]
    assert jnp.allclose(out2, ref2, atol=1e-5, rtol=1e-5), "multi-tile path mismatch"

    # TODO(synk): the fused add+dropout training kernel (pltpu.prng_*) is not run
    # here because the hardware PRNG primitives have no CPU/interpret lowering.

    print("KERNEL_OK")
</pallas_src>

<mosaic_0001>
module attributes {stable_mosaic.version = 11 : i64} {
  func.func @_pe_add_kernel(%arg0: i32, %arg1: memref<8x64xf32, #tpu.memory_space<vmem>>, %arg2: memref<8x32xf32, #tpu.memory_space<vmem>>, %arg3: memref<8x64xf32, #tpu.memory_space<vmem>>) attributes {dimension_semantics = [#tpu.dimension_semantics<parallel>], iteration_bounds = array<i64: 1>, scalar_prefetch = 0 : i64, scratch_operands = 0 : i64, tpu.core_type = #tpu.core_type<tc>, window_params = [{transform_indices = @transform_0, window_bounds = array<i64: 8, 64>}, {transform_indices = @transform_1, window_bounds = array<i64: 8, 32>}, {transform_indices = @transform_2, window_bounds = array<i64: 8, 64>}]} {
    %c0 = arith.constant 0 : index
    %c0_0 = arith.constant 0 : index
    %0 = vector.load %arg2[%c0, %c0_0] : memref<8x32xf32, #tpu.memory_space<vmem>>, vector<8x32xf32>
    %1 = tpu.concatenate %0, %0 in 1 : vector<8x32xf32>, vector<8x32xf32> -> vector<8x64xf32>
    %c0_1 = arith.constant 0 : index
    %c0_2 = arith.constant 0 : index
    %2 = vector.load %arg1[%c0_1, %c0_2] : memref<8x64xf32, #tpu.memory_space<vmem>>, vector<8x64xf32>
    %3 = arith.addf %2, %1 : vector<8x64xf32>
    %c0_3 = arith.constant 0 : index
    %c0_4 = arith.constant 0 : index
    %4 = vector.load %arg3[%c0_3, %c0_4] : memref<8x64xf32, #tpu.memory_space<vmem>>, vector<8x64xf32>
    tpu.vector_store %arg3[%c0_3, %c0_4], %3 {strides = array<i32>} : memref<8x64xf32, #tpu.memory_space<vmem>>, vector<8x64xf32>,
    return
  }
  func.func @transform_0(%arg0: i32) -> (i32, i32) {
    %c0_i32 = arith.constant 0 : i32
    %c0_i32_0 = arith.constant 0 : i32
    return %arg0, %c0_i32 : i32, i32
  }
  func.func @transform_1(%arg0: i32) -> (i32, i32) {
    %c0_i32 = arith.constant 0 : i32
    %c0_i32_0 = arith.constant 0 : i32
    return %arg0, %c0_i32 : i32, i32
  }
  func.func @transform_2(%arg0: i32) -> (i32, i32) {
    %c0_i32 = arith.constant 0 : i32
    %c0_i32_0 = arith.constant 0 : i32
    return %arg0, %c0_i32 : i32, i32
  }
}

</mosaic_0001>

<bundles_post_ra>
// kernel: tpu_custom_call.1
= control target key start
LH: loop header
LB: loop body
LE: loop exit
PB: predicated region body
PF: predicated region fallthrough
CT: control target
= control target key end

     0   :  { %s93_s0 = inlined_call_operand.vmem [shape: f32[8,64], index: 0, kind: input, shape index: {}]   ;;  %s94_s1 = inlined_call_operand.vmem [shape: f32[5000,32], index: 1, kind: input, shape index: {}]   ;;  %s95_s2 = inlined_call_operand.hbm [shape: f32[8,64], index: 2, kind: output, shape index: {}]  }
   0x1   :  { %v12_v0 = vld [vmem:[%s94_s1] sm:$0xff] }
   0x2   :  { %7 = vsyncpa [#allocation3], 0  ;;  %s67_s11 = smov 32   ;;  %vm17_vm0 = vcmask 261120   ;;  %v19_v1 = vld [vmem:[%s93_s0] sm:$0xff]  ;;  %s68_s14 = smov [#allocation2]  }
   0x3   :  { %14 = vrot.lane.b32.xlu0 %v12_v0, %s67_s11  ;;  %s28_s15 = sshll.u32 %s68_s14, 4  ;;  %s30_s18 = sshll.u32 %s95_s2, 4  ;;  %vm21_vm1 = vcmask 523264   ;;  %s29_s15 = int_to_ptr.vmem [resolvable:$true] %s28_s15  ;;  %s31_s18 = int_to_ptr.hbm [resolvable:$true] %s30_s18 }
  0x75   :  { %v15_v2 = vpop.permute.xlu0 %14 }
  0x76   :  { %v18_v3 = vsel %vm17_vm0, %v12_v0, %v15_v2 }
  0x77   :  { %v20_v4 = vadd.f32 %v19_v1, %v18_v3 }
  0x79   :  { %22 = vst.msk [vmem:[#allocation2] sm:$0xff] %vm21_vm1, %v20_v4 }
  0x7a   :  { %33 = dma.vmem_to_hbm [thread:$0]  %s29_s15, 128, %s31_s18, [#allocation3]  }
  0x7b   :  { %65 = dma.done.wait [#allocation3], 128  }
  0x7c   :  { %66 = vsyncadd [#allocation3], 4294967168 }
  0x7d   :  { %38 = vsyncpa [#allocation3], 1 }

</bundles_post_ra>
